<compile_context>
chip_gen: v5e
topology: v5e:2x2
jax: 0.10.0
libtpu: 0.0.40
codegen_flags: <defaults>
</compile_context>

<pallas_src>
import jax
import jax.numpy as jnp
from jax.experimental import pallas as pl
from jax.experimental.pallas import tpu as pltpu


def _round_up(v, m):
    return ((v + m - 1) // m) * m


def _pick_tile(n, block_n):
    """Pick the row/reduction tile (multiple of 128).

    Preference order:
      1) divides N exactly (no adj pad copy) with >= 2 row blocks (v7x megacore)
      2) >= 2 row blocks
      3) largest tile that does not over-pad a tiny graph
    """
    n128 = _round_up(max(n, 1), 128)
    cands = [t for t in (512, 256, 128) if t <= min(block_n, n128)]
    if not cands:
        return 128
    for t in cands:  # largest first
        if n % t == 0 and n // t >= 2:
            return t
    for t in cands:
        if _round_up(n, t) // t >= 2:
            return t
    return cands[0]


def _vmem_budget(need_bytes):
    # Actual need + headroom, clamped between Mosaic's 32 MiB scoped default
    # and v7x's 64 MiB physical VMEM (v5e/v6e have 128 MiB, so this is safe).
    return int(min(64 * 2**20, max(32 * 2**20, need_bytes + 16 * 2**20)))


def _support_kernel(x_ref, w_ref, s_ref):
    """Stage 1: one row block of support = X @ W (W is VMEM-resident)."""
    s_ref[...] = jnp.dot(
        x_ref[...], w_ref[...], preferred_element_type=jnp.float32
    ).astype(s_ref.dtype)


def _aggregate_kernel(adj_ref, s_ref, b_ref, out_ref, acc_ref):
    """Stage 2, one (row block i, reduction block k): out = adj @ support + b."""
    k = pl.program_id(1)

    @pl.when(k == 0)
    def _init():
        acc_ref[...] = jnp.zeros_like(acc_ref)

    # (bm, bk) x (bk, F_out) MXU accumulation, bf16 operands, f32 accumulate.
    acc_ref[...] += jnp.dot(
        adj_ref[...], s_ref[...], preferred_element_type=jnp.float32
    )

    @pl.when(k == pl.num_programs(1) - 1)
    def _finalize():
        out_ref[...] = (acc_ref[...] + b_ref[...]).astype(out_ref.dtype)


def graph_convolution_forward(x, adj, weight, bias=None, *, block_n=512,
                              compute_dtype=jnp.bfloat16):
    """GCN forward: adj @ (x @ weight) + bias.

    x:      (N, F_in)    node features
    adj:    (N, N)       dense (normalized) adjacency
    weight: (F_in, F_out)
    bias:   (F_out,) or None
    """
    n, f_in = x.shape
    f_out = weight.shape[1]
    assert adj.shape == (n, n)
    assert weight.shape[0] == f_in

    out_dtype = x.dtype
    tile_n = _pick_tile(n, block_n)
    n_pad = _round_up(n, tile_n)
    f_in_pad = _round_up(f_in, 128)    # lane-dense MXU K dim
    f_out_pad = _round_up(f_out, 128)  # lane-dense output stores

    # Cast to the MXU compute dtype *before* padding (pad pass moves half the
    # bytes); skip the pad entirely when shapes already align.  Zero padding
    # is exact for this op.
    def _prep(a, rows, cols, row_pad, col_pad):
        a = a.astype(compute_dtype)
        if row_pad != rows or col_pad != cols:
            a = jnp.pad(a, ((0, row_pad - rows), (0, col_pad - cols)))
        return a

    x_p = _prep(x, n, f_in, n_pad, f_in_pad)
    w_p = _prep(weight, f_in, f_out, f_in_pad, f_out_pad)
    # TODO(synk): for large, non-tile-aligned graphs this pad is an extra full
    # N^2 pass over adj; an in-kernel tail mask would avoid it.
    adj_p = _prep(adj, n, n, n_pad, n_pad)

    if bias is None:
        b_p = jnp.zeros((1, f_out_pad), jnp.float32)
    else:
        b_p = jnp.pad(bias.astype(jnp.float32).reshape(1, f_out),
                      ((0, 0), (0, f_out_pad - f_out)))

    csize = jnp.dtype(compute_dtype).itemsize
    osize = jnp.dtype(out_dtype).itemsize

    # ---------------- stage 1: support = X @ W ----------------
    bs1 = tile_n
    vmem1 = (2 * bs1 * f_in_pad * csize          # x tiles (double-buffered)
             + 2 * f_in_pad * f_out_pad * csize  # resident W
             + 2 * bs1 * f_out_pad * csize)      # support out tiles
    support = pl.pallas_call(
        _support_kernel,
        out_shape=jax.ShapeDtypeStruct((n_pad, f_out_pad), compute_dtype),
        grid_spec=pltpu.PrefetchScalarGridSpec(
            num_scalar_prefetch=0,
            grid=(n_pad // bs1,),
            in_specs=[
                pl.BlockSpec((bs1, f_in_pad), lambda i: (i, 0)),        # x rows
                pl.BlockSpec((f_in_pad, f_out_pad), lambda i: (0, 0)),  # weight
            ],
            out_specs=pl.BlockSpec((bs1, f_out_pad), lambda i: (i, 0)),
        ),
        compiler_params=pltpu.CompilerParams(
            dimension_semantics=("parallel",),
            vmem_limit_bytes=_vmem_budget(vmem1),
        ),
    )(x_p, w_p)

    # ---------------- stage 2: out = adj @ support + bias ----------------
    bm = bk = tile_n
    vmem2 = (2 * bm * bk * csize                 # adj tiles (double-buffered)
             + 2 * bk * f_out_pad * csize        # support tiles
             + 2 * f_out_pad * 4                 # bias
             + 2 * bm * f_out_pad * osize        # out tiles
             + bm * f_out_pad * 4)               # f32 accumulator scratch
    out_p = pl.pallas_call(
        _aggregate_kernel,
        out_shape=jax.ShapeDtypeStruct((n_pad, f_out_pad), out_dtype),
        grid_spec=pltpu.PrefetchScalarGridSpec(
            num_scalar_prefetch=0,
            grid=(n_pad // bm, n_pad // bk),
            in_specs=[
                pl.BlockSpec((bm, bk), lambda i, k: (i, k)),            # adj tile
                pl.BlockSpec((bk, f_out_pad), lambda i, k: (k, 0)),     # support
                pl.BlockSpec((1, f_out_pad), lambda i, k: (0, 0)),      # bias
            ],
            out_specs=pl.BlockSpec((bm, f_out_pad), lambda i, k: (i, 0)),
            scratch_shapes=[pltpu.VMEM((bm, f_out_pad), jnp.float32)],
        ),
        compiler_params=pltpu.CompilerParams(
            dimension_semantics=("parallel", "arbitrary"),
            vmem_limit_bytes=_vmem_budget(vmem2),
        ),
    )(adj_p, support, b_p)

    return out_p[:n, :f_out]


if __name__ == "__main__":
    # Small, module-consistent shapes (deliberately NOT tile-aligned to also
    # exercise the padding path): 200 nodes, 96 -> 64 features.  The tile
    # picker chooses tile_n=128 -> n_pad=256, grid=(2, 2): exercises both the
    # multi-step accumulator and the 2-way parallel row axis.
    n, f_in, f_out = 200, 96, 64
    key = jax.random.PRNGKey(0)
    k_x, k_a, k_w, k_b = jax.random.split(key, 4)

    x = jax.random.normal(k_x, (n, f_in), jnp.float32)

    # Row-normalized random adjacency (dense stand-in for the sparse adj that
    # torch.spmm would consume).
    a = (jax.random.uniform(k_a, (n, n)) < 0.1).astype(jnp.float32)
    a = a + jnp.eye(n, dtype=jnp.float32)
    adj = a / jnp.sum(a, axis=1, keepdims=True)

    stdv = 1.0 / jnp.sqrt(jnp.float32(f_out))
    weight = jax.random.uniform(k_w, (f_in, f_out), jnp.float32, -stdv, stdv)
    bias = jax.random.uniform(k_b, (f_out,), jnp.float32, -stdv, stdv)

    out = graph_convolution_forward(x, adj, weight, bias)
    out = jax.block_until_ready(out)

    ref = (jnp.dot(adj, jnp.dot(x, weight, precision="highest"),
                   precision="highest") + bias)
    assert out.shape == (n, f_out)
    max_err = float(jnp.max(jnp.abs(out - ref)))
    # bf16 operands / f32 accumulation tolerance.
    assert jnp.allclose(out, ref, atol=3e-2, rtol=3e-2), (
        f"output mismatch, max abs err {max_err}")

    print("KERNEL_OK")
</pallas_src>

<mosaic_0001>
module attributes {stable_mosaic.version = 11 : i64} {
  func.func @_support_kernel(%arg0: i32, %arg1: memref<128x128xbf16, #tpu.memory_space<vmem>>, %arg2: memref<128x128xbf16, #tpu.memory_space<vmem>>, %arg3: memref<128x128xbf16, #tpu.memory_space<vmem>>) attributes {dimension_semantics = [#tpu.dimension_semantics<parallel>], iteration_bounds = array<i64: 2>, scalar_prefetch = 0 : i64, scratch_operands = 0 : i64, tpu.core_type = #tpu.core_type<tc>, window_params = [{transform_indices = @transform_0, window_bounds = array<i64: 128, 128>}, {pipeline_mode = #tpu.pipeline_mode<synchronous>, transform_indices = @transform_1, window_bounds = array<i64: 128, 128>}, {transform_indices = @transform_2, window_bounds = array<i64: 128, 128>}]} {
    %c0 = arith.constant 0 : index
    %c0_0 = arith.constant 0 : index
    %0 = vector.load %arg1[%c0, %c0_0] : memref<128x128xbf16, #tpu.memory_space<vmem>>, vector<128x128xbf16>
    %c0_1 = arith.constant 0 : index
    %c0_2 = arith.constant 0 : index
    %1 = vector.load %arg2[%c0_1, %c0_2] : memref<128x128xbf16, #tpu.memory_space<vmem>>, vector<128x128xbf16>
    %cst = arith.constant dense<0.000000e+00> : vector<128x128xf32>
    %2 = tpu.matmul %0, %1, %cst {dimension_numbers = #tpu.dot_dimension_numbers<[1], [0], [0], [1], [0, 0, 1, 1], [], []>} : vector<128x128xbf16>, vector<128x128xbf16>, vector<128x128xf32> -> vector<128x128xf32>
    %3 = arith.truncf %2 : vector<128x128xf32> to vector<128x128xbf16>
    %c0_3 = arith.constant 0 : index
    %c0_4 = arith.constant 0 : index
    %4 = vector.load %arg3[%c0_3, %c0_4] : memref<128x128xbf16, #tpu.memory_space<vmem>>, vector<128x128xbf16>
    tpu.vector_store %arg3[%c0_3, %c0_4], %3 {strides = array<i32>} : memref<128x128xbf16, #tpu.memory_space<vmem>>, vector<128x128xbf16>,
    return
  }
  func.func @transform_0(%arg0: i32) -> (i32, i32) {
    %c0_i32 = arith.constant 0 : i32
    %c0_i32_0 = arith.constant 0 : i32
    return %arg0, %c0_i32 : i32, i32
  }
  func.func @transform_1(%arg0: i32) -> (i32, i32) {
    %c0_i32 = arith.constant 0 : i32
    %c0_i32_0 = arith.constant 0 : i32
    %c0_i32_1 = arith.constant 0 : i32
    return %c0_i32, %c0_i32_0 : i32, i32
  }
  func.func @transform_2(%arg0: i32) -> (i32, i32) {
    %c0_i32 = arith.constant 0 : i32
    %c0_i32_0 = arith.constant 0 : i32
    return %arg0, %c0_i32 : i32, i32
  }
}

</mosaic_0001>

<bundles_post_ra>
// kernel: tpu_custom_call.1
= control target key start
LH: loop header
LB: loop body
LE: loop exit
PB: predicated region body
PF: predicated region fallthrough
CT: control target
= control target key end

     0   :  { %7 = vsyncpa [#allocation3], 0  ;;  %s1031_s0 = inlined_call_operand.hbm [shape: bf16[256,128], index: 0, kind: input, shape index: {}]   ;;  %s1032_s1 = inlined_call_operand.hbm [shape: bf16[128,128], index: 1, kind: input, shape index: {}]   ;;  %s1033_s2 = inlined_call_operand.hbm [shape: bf16[256,128], index: 2, kind: output, shape index: {}]  }
   0x1   :  { %9 = vsyncpa [#allocation3 + $0x1], 0 }
   0x2   :  { %10 = vsyncpa [#allocation6], 0 }
   0x3   :  { %11 = vsyncpa [#allocation4], 0 }
   0x4   :  { %13 = vsyncpa [#allocation4 + $0x1], 0  ;;  %s873_s9 = smov 0   ;;  %s875_s10 = smov 0  }
   0x5   :  { %s877_s11 = smov 0   ;;  %s879_s12 = smov 0  }
   0x6 LB: > { %s894_s13 = sadd.s32 4294967295, %s851_s12   ;;  %s491_s14 = sadd.s32 4294967294, %s851_s12   ;;  %s851_s12 = sphi %s879_s12, %s1043_s12   ;;  %s847_s11 = sphi %s877_s11, %s1042_s11   ;;  %s843_s10 = sphi %s875_s10, %s1041_s10   ;;  %s839_s9 = sphi %s873_s9, %s1040_s9  }
   0x7   : > { %p39_p0 = scmp.ne.s32.totalorder %s843_s10, %s839_s9  ;;  %p40_p1 = scmp.eq.s32.totalorder %s894_s13, 0 }
   0x8   : > { %p84_p2 = scmp.eq.s32.totalorder %s894_s13, 1  ;;  %p90_p3 = scmp.eq.s32.totalorder %s491_s14, 1 }
   0x9   : > { %p903_p4 = por %p40_p1, %p39_p0  ;;  %p492_p5 = scmp.ge.s32.totalorder %s851_s12, 1 }
   0xa   : > { %p908_p6 = por %p90_p3, %p39_p0  ;;  %p97_p7 = scmp.lt.s32.totalorder %s851_s12, 3 }
   0xb   : > { %s108_s19 = sshll.u32 %s1032_s1, 4  ;;  %s853_s21 = smov [#allocation5]   ;;  %s109_s19 = int_to_ptr.hbm [resolvable:$true] %s108_s19 }
   0xc   : > { %p916_p8 = pnand %p492_p5, %p97_p7  ;;  %s110_s22 = sshll.u32 %s853_s21, 4  ;;  %s111_s22 = int_to_ptr.vmem [resolvable:$true] %s110_s22 }
   0xd   : > { %s926_s23 = sadd.s32 1, %s851_s12   ;;  %s854_s24 = smov 64  }
   0xe   : > { %p668_p9 = pneg %p916_p8  ;;  %s855_s25 = smov 4  }
   0xf   : > { %s23_s26 = ssub.s32 %s851_s12, %s926_s23  ;;  %s26_s27 = sadd.s32 1, %s847_s11 }
  0x10   : > { %p669_p10 = pnand %p668_p9, %p40_p1  ;;  %p24_p12 = scmp.eq.s32.totalorder %s23_s26, 0 }
  0x11   : > { %p33_p13 = scmp.ne.s32.totalorder %s847_s11, %s843_s10  ;;  %p34_p0 = scmp.eq.s32.totalorder %s851_s12, 0 }
  0x12   : > { %671 = dma.hbm_to_vmem [thread:$0]  (!%p669_p10), %s109_s19, 1024, %s111_s22, [#allocation6], %s854_s24, %s854_s24, %s855_s25  }
  0x13   : > { %s938_s28 = scalar_select %p24_p12, %s847_s11, %s26_s27  }
  0x14   : > { %p942_p3 = por %p84_p2, %p33_p13  ;;  %p681_p5 = scmp.lt.s32.totalorder %s851_s12, 2 }
  0x15   : > { %s124_s30 = sand.u32 1, %s847_s11   ;;  %s571_s3 = sshll.u32 %s851_s12, 6 }
  0x16   : > { %p35_p7 = por %p34_p0, %p33_p13  ;;  %s495_s4 = sshll.u32 %s124_s30, 6 }
  0x17   : > { %s133_s7 = scalar_lea.hbm %s1031_s0, %s571_s3  ;;  %s128_s14 = scalar_lea.vmem [#allocation2], %s495_s4 }
  0x18   : > { %s134_s8 = sshll.u32 %s133_s7, 4  ;;  %s136_s17 = sshll.u32 %s128_s14, 4  ;;  %s135_s8 = int_to_ptr.hbm [resolvable:$true] %s134_s8  ;;  %s137_s17 = int_to_ptr.vmem [resolvable:$true] %s136_s17 }
  0x19   : > { %p952_p9 = pnand %p681_p5, %p35_p7  ;;  %s125_s19 = scalar_lea.sflag [#allocation3], %s124_s30 }
  0x1a   : > { %s751_s21 = sshra.s32 %s135_s8, 4  ;;  %s758_s3 = scalar_lea.hbm %s1031_s0, 128  ;;  %s752_s21 = int_to_ptr.hbm [resolvable:$true] %s751_s21 }
  0x1b   : > { %s753_s22 = scalar_lea.hbm %s752_s21, 64  ;;  %p755_p10 = pneg %p952_p9 }
  0x1c   : > { %p754_p2 = scmp.ne.s32.totalorder %s752_s21, %s753_s22  ;;  %p759_p0 = scmp.lt.s32.totalorder %s752_s21, %s1031_s0 }
  0x1d   : > { %p760_p5 = scmp.lt.s32.totalorder %s758_s3, %s753_s22 }
  0x1e   : > { %p756_p12 = pnand %p755_p10, %p754_p2 }
  0x1f   : > { %p761_p7 = por %p760_p5, %p759_p0 }
  0x20   : > { %p757_p13 = pneg %p756_p12 }
  0x22   : > { %p762_p11 = pnand %p761_p7, %p757_p13 }
  0x24   : > { %765 = shalt.err (!%p762_p11)
}
  0x25   : > { %675 = dma.hbm_to_vmem [thread:$0]  (!%p952_p9), %s135_s8, 1024, %s137_s17, %s125_s19, %s854_s24, %s854_s24, %s855_s25  }
  0x26   : > { %148 = sbr.rel (%p916_p8) target bundleno = 242 (0xf2), region = 28  ;;  %s972_s30 = sand.u32 (!%p916_p8), 1, %s843_s10  }
  0x27   : > { %s499_s6 = sshll.u32 (!%p916_p8), %s972_s30, 6  ;;  %s151_s7 = scalar_lea.sflag (!%p916_p8), [#allocation3], %s972_s30 }
  0x28   : > { %s978_s14 = scalar_lea.vmem (!%p916_p8), [#allocation2], %s499_s6 }
  0x2b   : > { %826 = dma.done.wait (%p903_p4), %s151_s7, 1024  }
  0x2c   : > { %828 = vsyncadd (%p903_p4), %s151_s7, 4294966272 }
  0x2d   : > { %830 = dma.done.wait (%p40_p1), [#allocation6], 1024  }
  0x2e   : > { %832 = vsyncadd (%p40_p1), [#allocation6], 4294966272  ;;  %v587_v0 = vld [vmem:[#allocation5 + $0x38] sm:$0xff]  ;;  %v586_v1 = vld [vmem:[#allocation5 + $0x30] sm:$0xff]  ;;  %s180_s15 = scalar_lea.vmem [#allocation7], %s499_s6  ;;  %s588_s20 = sshll.u32 %s894_s13, 6 }
  0x2f   : > { %311 = vmatpush.bf16.msra.mxu0 %v587_v0  ;;  %636 = vmatpush.bf16.msra.mxu1 %v587_v0  ;;  %v585_v2 = vld [vmem:[#allocation5 + $0x28] sm:$0xff]  ;;  %v584_v3 = vld [vmem:[#allocation5 + $0x20] sm:$0xff]  ;;  %v583_v4 = vld [vmem:[#allocation5 + $0x18] sm:$0xff]  ;;  %s404_s8 = scalar_lea.hbm %s1033_s2, %s588_s20  ;;  %s405_s17 = sshll.u32 %s180_s15, 4  ;;  %s406_s17 = int_to_ptr.vmem [resolvable:$true] %s405_s17 }
  0x30   : > { %637 = vmatpush.bf16.msra.mxu2 %v587_v0  ;;  %638 = vmatpush.bf16.msra.mxu3 %v587_v0  ;;  %v582_v5 = vld [vmem:[#allocation5 + $0x10] sm:$0xff]  ;;  %v581_v6 = vld [vmem:[#allocation5 + $0x8] sm:$0xff]  ;;  %v580_v7 = vld [vmem:[#allocation5] sm:$0xff]  ;;  %s407_s18 = sshll.u32 %s404_s8, 4  ;;  %s393_s13 = scalar_lea.sflag [#allocation4], %s972_s30  ;;  %s408_s18 = int_to_ptr.hbm [resolvable:$true] %s407_s18 }
  0x31   : > { %v572_v8 = vld [vmem:[%s978_s14] sm:$0xff]  ;;  %v574_v9 = vld [vmem:[%s978_s14 + $0x10] sm:$0xff]  ;;  %v573_v12 = vld [vmem:[%s978_s14 + $0x8] sm:$0xff]  ;;  %s795_s19 = sshra.s32 %s408_s18, 4  ;;  %s801_s27 = scalar_lea.hbm %s1033_s2, 128  ;;  %s796_s19 = int_to_ptr.hbm [resolvable:$true] %s795_s19 }
  0x32   : > { %v576_v10 = vld [vmem:[%s978_s14 + $0x20] sm:$0xff]  ;;  %v578_v11 = vld [vmem:[%s978_s14 + $0x30] sm:$0xff]  ;;  %v575_v13 = vld [vmem:[%s978_s14 + $0x18] sm:$0xff]  ;;  %s797_s21 = scalar_lea.hbm %s796_s19, 64  ;;  %p802_p11 = scmp.lt.s32.totalorder %s796_s19, %s1033_s2 }
  0x33   : > { %312 = vmatpush.bf16.msra.mxu0 %v586_v1  ;;  %639 = vmatpush.bf16.msra.mxu1 %v586_v1  ;;  %v577_v14 = vld [vmem:[%s978_s14 + $0x28] sm:$0xff]  ;;  %v579_v15 = vld [vmem:[%s978_s14 + $0x38] sm:$0xff]  ;;  %p798_p1 = scmp.ne.s32.totalorder %s796_s19, %s797_s21  ;;  %p803_p9 = scmp.lt.s32.totalorder %s801_s27, %s797_s21 }
  0x34   : > { %640 = vmatpush.bf16.msra.mxu2 %v586_v1  ;;  %641 = vmatpush.bf16.msra.mxu3 %v586_v1 }
  0x35   : > { %p799_p4 = pnand %p798_p1, %p942_p3  ;;  %p804_p2 = por %p803_p9, %p802_p11 }
  0x37   : > { %313 = vmatpush.bf16.msra.mxu0 %v585_v2  ;;  %642 = vmatpush.bf16.msra.mxu1 %v585_v2  ;;  %p800_p8 = pneg %p799_p4 }
  0x38   : > { %643 = vmatpush.bf16.msra.mxu2 %v585_v2  ;;  %644 = vmatpush.bf16.msra.mxu3 %v585_v2 }
  0x39   : > { %p805_p10 = pnand %p804_p2, %p800_p8 }
  0x3b   : > { %314 = vmatpush.bf16.msra.mxu0 %v584_v3  ;;  %645 = vmatpush.bf16.msra.mxu1 %v584_v3 }
  0x3c   : > { %646 = vmatpush.bf16.msra.mxu2 %v584_v3  ;;  %647 = vmatpush.bf16.msra.mxu3 %v584_v3 }
  0x3f   : > { %315 = vmatpush.bf16.msra.mxu0 %v583_v4  ;;  %648 = vmatpush.bf16.msra.mxu1 %v583_v4 }
  0x40   : > { %649 = vmatpush.bf16.msra.mxu2 %v583_v4  ;;  %650 = vmatpush.bf16.msra.mxu3 %v583_v4 }
  0x43   : > { %316 = vmatpush.bf16.msra.mxu0 %v582_v5  ;;  %651 = vmatpush.bf16.msra.mxu1 %v582_v5 }
  0x44   : > { %652 = vmatpush.bf16.msra.mxu2 %v582_v5  ;;  %653 = vmatpush.bf16.msra.mxu3 %v582_v5 }
  0x47   : > { %317 = vmatpush.bf16.msra.mxu0 %v581_v6  ;;  %654 = vmatpush.bf16.msra.mxu1 %v581_v6 }
  0x48   : > { %655 = vmatpush.bf16.msra.mxu2 %v581_v6  ;;  %656 = vmatpush.bf16.msra.mxu3 %v581_v6 }
  0x4b   : > { %318 = vmatpush.bf16.msra.mxu0 %v580_v7  ;;  %657 = vmatpush.bf16.msra.mxu1 %v580_v7 }
  0x4c   : > { %658 = vmatpush.bf16.msra.mxu2 %v580_v7  ;;  %659 = vmatpush.bf16.msra.mxu3 %v580_v7 }
  0x4e   : > { %319 = vmatmul.bf16.vlgmr.msra.gmra.mxu0 %v572_v8  ;;  %329 = vmatmul.bf16.vlgmr.msra.gmra.mxu1 %v574_v9 }
  0x4f   : > { %339 = vmatmul.bf16.vlgmr.msra.gmra.mxu2 %v576_v10  ;;  %349 = vmatmul.bf16.vlgmr.msra.gmra.mxu3 %v578_v11 }
  0x5e   : > { %324 = vmatmul.bf16.gmra.mxu0 %v573_v12  ;;  %334 = vmatmul.bf16.gmra.mxu1 %v575_v13 }
  0x5f   : > { %344 = vmatmul.bf16.gmra.mxu2 %v577_v14  ;;  %354 = vmatmul.bf16.gmra.mxu3 %v579_v15 }
  0xcb   : > { %v320_v16 = vpop.f32.mrf.mxu0  ;;  %v330_v17 = vpop.f32.mrf.mxu1 }
  0xd2   : > { %v340_v18 = vpop.f32.mrf.mxu2  ;;  %v350_v19 = vpop.f32.mrf.mxu3 }
  0xd3   : > { %v322_v20 = vpop.f32.mrf.mxu0  ;;  %v332_v21 = vpop.f32.mrf.mxu1 }
  0xd4   : > { %v592_v22 = vpack.c.bf16 %v322_v20, %v320_v16  ;;  %v602_v23 = vpack.c.bf16 %v332_v21, %v330_v17 }
  0xd6   : > { %593 = vst [vmem:[%s180_s15] sm:$0xff] %v592_v22  }
  0xd7   : > { %630 = vst [vmem:[%s180_s15 + $0x10] sm:$0xff] %v602_v23  }
  0xda   : > { %v342_v24 = vpop.f32.mrf.mxu2  ;;  %v352_v25 = vpop.f32.mrf.mxu3 }
  0xdb   : > { %v612_v26 = vpack.c.bf16 %v342_v24, %v340_v18  ;;  %v622_v27 = vpack.c.bf16 %v352_v25, %v350_v19  ;;  %v325_v28 = vpop.f32.mrf.mxu0  ;;  %v335_v29 = vpop.f32.mrf.mxu1 }
  0xdd   : > { %632 = vst [vmem:[%s180_s15 + $0x20] sm:$0xff] %v612_v26  }
  0xde   : > { %634 = vst [vmem:[%s180_s15 + $0x30] sm:$0xff] %v622_v27  }
  0xe2   : > { %v345_v30 = vpop.f32.mrf.mxu2  ;;  %v355_v31 = vpop.f32.mrf.mxu3 }
  0xe3   : > { %v327_v32 = vpop.f32.mrf.mxu0  ;;  %v337_v33 = vpop.f32.mrf.mxu1 }
  0xe4   : > { %v597_v34 = vpack.c.bf16 %v327_v32, %v325_v28  ;;  %v607_v35 = vpack.c.bf16 %v337_v33, %v335_v29 }
  0xe6   : > { %629 = vst [vmem:[%s180_s15 + $0x8] sm:$0xff] %v597_v34  }
  0xe7   : > { %631 = vst [vmem:[%s180_s15 + $0x18] sm:$0xff] %v607_v35  }
  0xea   : > { %v347_v36 = vpop.f32.mrf.mxu2  ;;  %v357_v37 = vpop.f32.mrf.mxu3 }
  0xeb   : > { %v617_v38 = vpack.c.bf16 %v347_v36, %v345_v30  ;;  %v627_v39 = vpack.c.bf16 %v357_v37, %v355_v31 }
  0xed   : > { %633 = vst [vmem:[%s180_s15 + $0x28] sm:$0xff] %v617_v38  }
  0xee   : > { %635 = vst [vmem:[%s180_s15 + $0x38] sm:$0xff] %v627_v39  }
  0xef   : > { %808 = shalt.err (!%p805_p10)
}
  0xf0   : > { %s856_s5 = smov 64   ;;  %s857_s30 = smov 4  }
  0xf1   : > { %666 = dma.vmem_to_hbm [thread:$0]  (%p942_p3), %s406_s17, 1024, %s408_s18, %s393_s13, %s856_s5, %s856_s5, %s857_s30  }
  0xf2 PF: > { %s422_s6 = sand.u32 1, %s839_s9   ;;  %p1039_p12 = scmp.ge.s32.totalorder %s851_s12, 2 }
  0xf3   : > { %s423_s7 = scalar_lea.sflag [#allocation4], %s422_s6 }
  0xf4   : > { %p677_p13 = pnand %p1039_p12, %p908_p6 }
  0xf6   : > { %p678_p0 = pneg %p677_p13 }
  0xf8   : > { %834 = dma.done.wait (%p678_p0), %s423_s7, 1024  }
  0xf9   : > { %836 = vsyncadd (%p678_p0), %s423_s7, 4294966272  ;;  %p16_p5 = scmp.ge.s32.totalorder %s926_s23, 4   ;;  %s1040_s9 = smov %s843_s10 }
  0xfa   : > { %s1041_s10 = smov %s847_s11  ;;  %s1042_s11 = smov %s938_s28 }
  0xfb   : > { %s1043_s12 = smov %s926_s23  ;;  %18 = sbr.rel (!%p16_p5) target bundleno = 6 (0x6), region = 77 }
 0x100   :  { %429 = vsyncpa [#allocation3], 1 }
 0x101   :  { %431 = vsyncpa [#allocation3 + $0x1], 1 }
 0x102   :  { %432 = vsyncpa [#allocation6], 1 }
 0x103   :  { %433 = vsyncpa [#allocation4], 1 }
 0x104   :  { %435 = vsyncpa [#allocation4 + $0x1], 1 }

</bundles_post_ra>
